<compile_context>
chip_gen: v7x
topology: tpu7x:2x2x1
jax: 0.10.0
libtpu: 0.0.40
codegen_flags: <defaults>
</compile_context>

<pallas_src>
import jax
import jax.numpy as jnp
from jax import lax
from jax.experimental import pallas as pl
from jax.experimental.pallas import tpu as pltpu

LANE = 128


def _round_up(x, m):
    return ((x + m - 1) // m) * m


def _pad2(a, rows, cols):
    return jnp.pad(a, ((0, rows - a.shape[0]), (0, cols - a.shape[1])))


# ---------- Kernel 1: spectral projection (reduction over node-row tiles) ----
def _spectral_kernel(evecs_ref, x_ref, scale_ref, xds_ref):
    i = pl.program_id(0)

    @pl.when(i == 0)
    def _():
        xds_ref[...] = jnp.zeros_like(xds_ref)

    # x_spec += evecs^T @ x without an in-kernel transpose: contract dim 0 of
    # both operands so the MXU consumes the transposed LHS natively (no XLU).
    xds_ref[...] += lax.dot_general(
        evecs_ref[...],                          # bf16 [TN, kp]
        x_ref[...].astype(jnp.bfloat16),         # bf16 [TN, Cp]
        dimension_numbers=(((0,), (0,)), ((), ())),
        preferred_element_type=jnp.float32)

    @pl.when(i == pl.num_programs(0) - 1)
    def _():
        # x_dspec = (exp(-evals*t) - alpha) * x_spec  (scale precomputed in wrapper)
        xds_ref[...] *= scale_ref[...]


# ---------- Kernel 2: diffuse + GCN feature transform (row-parallel) ---------
def _diffuse_h_kernel(evecs_ref, x_ref, xds_ref, betta_ref, dinv_ref, wg_ref,
                      sh_ref):
    x = x_ref[...]                                              # f32 [TN, Cp]
    x_diffuse = jnp.dot(evecs_ref[...], xds_ref[...].astype(jnp.bfloat16),
                        preferred_element_type=jnp.float32)
    x_diffuse = x_diffuse + betta_ref[...] * x                  # f32
    h = jnp.dot(x_diffuse.astype(jnp.bfloat16), wg_ref[...],
                preferred_element_type=jnp.float32)             # [TN, Cp]
    # Row scale by D^-1/2 here; the column scale is applied in kernel 3.
    sh_ref[...] = (dinv_ref[...] * h).astype(sh_ref.dtype)      # bf16 out


# ---------- Kernel 3: GCN aggregation over L + MLP + residual ----------------
def _gcn_mlp_kernel(L_ref, sh_ref, x_ref, dinv_ref, bg_ref, w1a_ref, w1b_ref,
                    b1_ref, w2_ref, b2_ref, o_ref, acc_ref):
    j = pl.program_id(1)

    @pl.when(j == 0)
    def _():
        acc_ref[...] = jnp.zeros_like(acc_ref)

    # g[c,:] += sum_r L[r,c] * sh[r,:] == contraction over L's dim 0; no
    # materialized A_norm, no transpose, no N^2 elementwise multiply.
    acc_ref[...] += lax.dot_general(
        L_ref[...], sh_ref[...],
        dimension_numbers=(((0,), (0,)), ((), ())),
        preferred_element_type=jnp.float32)

    @pl.when(j == pl.num_programs(1) - 1)
    def _():
        x = x_ref[...]                                          # f32 [TN, Cp]
        g = dinv_ref[...] * acc_ref[...] + bg_ref[...]
        x_gcn = jnp.maximum(g, 0.0)                             # relu (idempotent twice)
        # MiniMLP([2C, H, C]) on concat(x, x_gcn); concat folded into split W1.
        h1 = (jnp.dot(x.astype(jnp.bfloat16), w1a_ref[...],
                      preferred_element_type=jnp.float32)
              + jnp.dot(x_gcn.astype(jnp.bfloat16), w1b_ref[...],
                        preferred_element_type=jnp.float32)
              + b1_ref[...])
        h1 = jnp.maximum(h1, 0.0)
        out = jnp.dot(h1.astype(jnp.bfloat16), w2_ref[...],
                      preferred_element_type=jnp.float32) + b2_ref[...]
        o_ref[...] = (out + x).astype(o_ref.dtype)              # residual


def tide_block_forward(x_in, evecs, evals, L_dense, params, *, tile_n=256):
    N, C = x_in.shape
    k = evals.shape[0]
    H = params["b1"].shape[-1]

    f32, bf16 = jnp.float32, jnp.bfloat16
    Cp = _round_up(C, LANE)
    Hp = _round_up(H, LANE)
    kp = _round_up(k, LANE)
    TN = min(tile_n, _round_up(N, 8))      # row tile (multiple of 8; 256 => lane-ok L tiles)
    Np = _round_up(N, TN)
    n_row = Np // TN

    # ---- wrapper precompute (removed from kernels per review) ----
    t = params["diffusion_time"].astype(f32)
    scale = jnp.exp(-evals.astype(f32)[:, None] * t[None, :]) - params["alpha"]
    scale_p = _pad2(scale, kp, Cp)

    L32 = L_dense.astype(f32)
    deg = jnp.sum(L32, axis=0)                                  # gcn_norm column sums
    dinv = jnp.where(deg > 0, lax.rsqrt(deg), 0.0)              # guard deg <= 0
    dinv_p = _pad2(dinv[:, None], Np, 1)

    x_p = _pad2(x_in.astype(f32), Np, Cp)                       # f32 (VPU / residual path)
    evecs_p = _pad2(evecs.astype(f32), Np, kp).astype(bf16)     # pure MXU operand
    L_p = _pad2(L32, Np, Np).astype(bf16)                       # halves the O(N^2) HBM stream

    w1 = params["w1"].astype(f32)
    w1a = _pad2(w1[:C], Cp, Hp).astype(bf16)
    w1b = _pad2(w1[C:], Cp, Hp).astype(bf16)
    wg = _pad2(params["w_gcn"].astype(f32), Cp, Cp).astype(bf16)
    w2 = _pad2(params["w2"].astype(f32), Hp, Cp).astype(bf16)
    bg = _pad2(params["b_gcn"].astype(f32)[None, :], 1, Cp)
    b1 = _pad2(params["b1"].astype(f32)[None, :], 1, Hp)
    b2 = _pad2(params["b2"].astype(f32)[None, :], 1, Cp)
    betta_row = jnp.full((1, Cp), params["betta"], f32)         # hoisted broadcast

    # ---- K1: x_dspec = scale * (evecs^T @ x)  (reduction over row tiles) ----
    xds = pl.pallas_call(
        _spectral_kernel,
        out_shape=jax.ShapeDtypeStruct((kp, Cp), f32),
        grid=(n_row,),
        in_specs=[
            pl.BlockSpec((TN, kp), lambda i: (i, 0)),
            pl.BlockSpec((TN, Cp), lambda i: (i, 0)),
            pl.BlockSpec((kp, Cp), lambda i: (0, 0)),
        ],
        out_specs=pl.BlockSpec((kp, Cp), lambda i: (0, 0)),     # resident accumulator
        compiler_params=pltpu.CompilerParams(
            dimension_semantics=("arbitrary",)),
        cost_estimate=pl.CostEstimate(
            flops=2 * Np * kp * Cp, transcendentals=0,
            bytes_accessed=Np * kp * 2 + Np * Cp * 4 + 2 * kp * Cp * 4),
    )(evecs_p, x_p, scale_p)

    # ---- K2: sh = dinv * ((evecs @ x_dspec + betta*x) @ W_gcn)  (row-parallel) ----
    sh = pl.pallas_call(
        _diffuse_h_kernel,
        out_shape=jax.ShapeDtypeStruct((Np, Cp), bf16),
        grid=(n_row,),
        in_specs=[
            pl.BlockSpec((TN, kp), lambda i: (i, 0)),
            pl.BlockSpec((TN, Cp), lambda i: (i, 0)),
            pl.BlockSpec((kp, Cp), lambda i: (0, 0)),
            pl.BlockSpec((1, Cp), lambda i: (0, 0)),
            pl.BlockSpec((TN, 1), lambda i: (i, 0)),
            pl.BlockSpec((Cp, Cp), lambda i: (0, 0)),
        ],
        out_specs=pl.BlockSpec((TN, Cp), lambda i: (i, 0)),
        compiler_params=pltpu.CompilerParams(
            dimension_semantics=("parallel",)),
        cost_estimate=pl.CostEstimate(
            flops=2 * Np * kp * Cp + 2 * Np * Cp * Cp, transcendentals=0,
            bytes_accessed=(Np * kp * 2 + Np * Cp * 4 + kp * Cp * 4
                            + Cp * Cp * 2 + Np * Cp * 2)),
    )(evecs_p, x_p, xds, betta_row, dinv_p, wg)

    # ---- K3: out = MLP(x, relu(dinv*(L^T@sh)+bg)) + x
    #      grid = (output row tiles [parallel], L-row reduction tiles [arbitrary]) ----
    out_p = pl.pallas_call(
        _gcn_mlp_kernel,
        out_shape=jax.ShapeDtypeStruct((Np, Cp), f32),
        grid=(n_row, n_row),
        in_specs=[
            pl.BlockSpec((TN, TN), lambda i, j: (j, i)),   # L rows j, cols i
            pl.BlockSpec((TN, Cp), lambda i, j: (j, 0)),   # sh rows j
            pl.BlockSpec((TN, Cp), lambda i, j: (i, 0)),   # x rows i
            pl.BlockSpec((TN, 1), lambda i, j: (i, 0)),    # dinv rows i
            pl.BlockSpec((1, Cp), lambda i, j: (0, 0)),    # b_gcn
            pl.BlockSpec((Cp, Hp), lambda i, j: (0, 0)),   # w1a
            pl.BlockSpec((Cp, Hp), lambda i, j: (0, 0)),   # w1b
            pl.BlockSpec((1, Hp), lambda i, j: (0, 0)),    # b1
            pl.BlockSpec((Hp, Cp), lambda i, j: (0, 0)),   # w2
            pl.BlockSpec((1, Cp), lambda i, j: (0, 0)),    # b2
        ],
        out_specs=pl.BlockSpec((TN, Cp), lambda i, j: (i, 0)),
        scratch_shapes=[pltpu.VMEM((TN, Cp), f32)],
        compiler_params=pltpu.CompilerParams(
            dimension_semantics=("parallel", "arbitrary")),
        cost_estimate=pl.CostEstimate(
            flops=2 * Np * Np * Cp + 4 * Np * Cp * Hp + 2 * Np * Hp * Cp,
            transcendentals=0,
            bytes_accessed=(Np * Np * 2 + n_row * Np * Cp * 2 + 2 * Np * Cp * 4
                            + 2 * Cp * Hp * 2 + Hp * Cp * 2)),
    )(L_p, sh, x_p, dinv_p, bg, w1a, w1b, b1, w2, b2)

    return out_p[:N, :C].astype(x_in.dtype)


def init_params(key, C, H):
    ks = jax.random.split(key, 3)

    def glorot(kk, fan_in, fan_out):
        lim = (6.0 / (fan_in + fan_out)) ** 0.5
        return jax.random.uniform(kk, (fan_in, fan_out), jnp.float32, -lim, lim)

    return dict(
        diffusion_time=jnp.zeros((C,), jnp.float32),   # nn.init.constant_(·, 0.0)
        alpha=jnp.float32(0.0),
        betta=jnp.float32(0.0),
        w_gcn=glorot(ks[0], C, C),
        b_gcn=jnp.zeros((C,), jnp.float32),
        w1=glorot(ks[1], 2 * C, H),
        b1=jnp.zeros((H,), jnp.float32),
        w2=glorot(ks[2], H, C),
        b2=jnp.zeros((C,), jnp.float32),
    )


def tide_block_reference(x, evecs, evals, L, p):
    """Pure-JAX f32 reference of the original forward."""
    t = p["diffusion_time"]
    x_spec = evecs.T @ x
    coefs = jnp.exp(-evals[:, None] * t[None, :])
    x_dspec = coefs * x_spec - p["alpha"] * x_spec
    x_diffuse = evecs @ x_dspec + p["betta"] * x
    deg = jnp.sum(L, axis=0)
    dinv = jnp.where(deg > 0, 1.0 / jnp.sqrt(deg), 0.0)
    A = dinv[:, None] * L * dinv[None, :]
    h = x_diffuse @ p["w_gcn"]
    x_gcn = jnp.maximum(A.T @ h + p["b_gcn"], 0.0)
    cat = jnp.concatenate([x, x_gcn], axis=-1)
    h1 = jnp.maximum(cat @ p["w1"] + p["b1"], 0.0)
    return h1 @ p["w2"] + p["b2"] + x


if __name__ == "__main__":
    key = jax.random.PRNGKey(0)
    N, C, k, H = 16, 32, 8, 32   # num_nodes, C_width, eigenpairs, mlp hidden

    k_x, k_e, k_ev, k_L, k_p = jax.random.split(key, 5)
    x_in = jax.random.normal(k_x, (N, C), jnp.float32)
    evecs = jax.random.normal(k_e, (N, k), jnp.float32)
    evals = jax.random.uniform(k_ev, (k,), jnp.float32)
    # Dense symmetric "Laplacian" with positive column sums so GCN degree
    # normalization is well-defined (plays the role of L._indices()/_values()).
    A = jax.random.uniform(k_L, (N, N), jnp.float32)
    L_dense = A + A.T + N * jnp.eye(N, dtype=jnp.float32)

    params = init_params(k_p, C, H)

    out = jax.block_until_ready(tide_block_forward(x_in, evecs, evals, L_dense, params))
    assert out.shape == (N, C) and out.dtype == jnp.float32

    ref = tide_block_reference(x_in, evecs, evals, L_dense, params)
    rel = jnp.linalg.norm(out - ref) / (jnp.linalg.norm(ref) + 1e-12)
    assert float(rel) < 0.1, f"relative error too large: {float(rel)}"

    print("KERNEL_OK")
</pallas_src>

<mosaic_0001>
module attributes {stable_mosaic.version = 11 : i64} {
  func.func @_spectral_kernel(%arg0: i32, %arg1: memref<16x128xbf16, #tpu.memory_space<vmem>>, %arg2: memref<16x128xf32, #tpu.memory_space<vmem>>, %arg3: memref<128x128xf32, #tpu.memory_space<vmem>>, %arg4: memref<128x128xf32, #tpu.memory_space<vmem>>) attributes {dimension_semantics = [#tpu.dimension_semantics<arbitrary>], iteration_bounds = array<i64: 1>, scalar_prefetch = 0 : i64, scratch_operands = 0 : i64, tpu.core_type = #tpu.core_type<tc>, window_params = [{transform_indices = @transform_0, window_bounds = array<i64: 16, 128>}, {transform_indices = @transform_1, window_bounds = array<i64: 16, 128>}, {pipeline_mode = #tpu.pipeline_mode<synchronous>, transform_indices = @transform_2, window_bounds = array<i64: 128, 128>}, {pipeline_mode = #tpu.pipeline_mode<synchronous>, transform_indices = @transform_3, window_bounds = array<i64: 128, 128>}]} {
    %c0_i32 = arith.constant 0 : i32
    %0 = arith.cmpi eq, %arg0, %c0_i32 : i32
    %1 = arith.extui %0 : i1 to i32
    %c0_i32_0 = arith.constant 0 : i32
    %2 = arith.cmpi ne, %1, %c0_i32_0 : i32
    scf.if %2 {
      %cst_10 = arith.constant 0.000000e+00 : f32
      %13 = vector.broadcast %cst_10 : f32 to vector<128x128xf32>
      %c0_11 = arith.constant 0 : index
      %c0_12 = arith.constant 0 : index
      %14 = vector.load %arg4[%c0_11, %c0_12] : memref<128x128xf32, #tpu.memory_space<vmem>>, vector<128x128xf32>
      tpu.vector_store %arg4[%c0_11, %c0_12], %13 {strides = array<i32>} : memref<128x128xf32, #tpu.memory_space<vmem>>, vector<128x128xf32>,
    } else {
    }
    %c0 = arith.constant 0 : index
    %c0_1 = arith.constant 0 : index
    %3 = vector.load %arg4[%c0, %c0_1] : memref<128x128xf32, #tpu.memory_space<vmem>>, vector<128x128xf32>
    %c0_2 = arith.constant 0 : index
    %c0_3 = arith.constant 0 : index
    %4 = vector.load %arg1[%c0_2, %c0_3] : memref<16x128xbf16, #tpu.memory_space<vmem>>, vector<16x128xbf16>
    %c0_4 = arith.constant 0 : index
    %c0_5 = arith.constant 0 : index
    %5 = vector.load %arg2[%c0_4, %c0_5] : memref<16x128xf32, #tpu.memory_space<vmem>>, vector<16x128xf32>
    %6 = arith.truncf %5 : vector<16x128xf32> to vector<16x128xbf16>
    %cst = arith.constant dense<0.000000e+00> : vector<128x128xf32>
    %7 = tpu.matmul %4, %6, %cst {dimension_numbers = #tpu.dot_dimension_numbers<[0], [0], [1], [1], [0, 1, 1, 1], [], []>} : vector<16x128xbf16>, vector<16x128xbf16>, vector<128x128xf32> -> vector<128x128xf32>
    %8 = arith.addf %3, %7 : vector<128x128xf32>
    %c0_6 = arith.constant 0 : index
    %c0_7 = arith.constant 0 : index
    %9 = vector.load %arg4[%c0_6, %c0_7] : memref<128x128xf32, #tpu.memory_space<vmem>>, vector<128x128xf32>
    tpu.vector_store %arg4[%c0_6, %c0_7], %8 {strides = array<i32>} : memref<128x128xf32, #tpu.memory_space<vmem>>, vector<128x128xf32>,
    %c0_i32_8 = arith.constant 0 : i32
    %10 = arith.cmpi eq, %arg0, %c0_i32_8 : i32
    %11 = arith.extui %10 : i1 to i32
    %c0_i32_9 = arith.constant 0 : i32
    %12 = arith.cmpi ne, %11, %c0_i32_9 : i32
    scf.if %12 {
      %c0_10 = arith.constant 0 : index
      %c0_11 = arith.constant 0 : index
      %13 = vector.load %arg4[%c0_10, %c0_11] : memref<128x128xf32, #tpu.memory_space<vmem>>, vector<128x128xf32>
      %c0_12 = arith.constant 0 : index
      %c0_13 = arith.constant 0 : index
      %14 = vector.load %arg3[%c0_12, %c0_13] : memref<128x128xf32, #tpu.memory_space<vmem>>, vector<128x128xf32>
      %15 = arith.mulf %13, %14 : vector<128x128xf32>
      %c0_14 = arith.constant 0 : index
      %c0_15 = arith.constant 0 : index
      %16 = vector.load %arg4[%c0_14, %c0_15] : memref<128x128xf32, #tpu.memory_space<vmem>>, vector<128x128xf32>
      tpu.vector_store %arg4[%c0_14, %c0_15], %15 {strides = array<i32>} : memref<128x128xf32, #tpu.memory_space<vmem>>, vector<128x128xf32>,
    } else {
    }
    return
  }
  func.func @transform_0(%arg0: i32) -> (i32, i32) {
    %c0_i32 = arith.constant 0 : i32
    %c0_i32_0 = arith.constant 0 : i32
    return %arg0, %c0_i32 : i32, i32
  }
  func.func @transform_1(%arg0: i32) -> (i32, i32) {
    %c0_i32 = arith.constant 0 : i32
    %c0_i32_0 = arith.constant 0 : i32
    return %arg0, %c0_i32 : i32, i32
  }
  func.func @transform_2(%arg0: i32) -> (i32, i32) {
    %c0_i32 = arith.constant 0 : i32
    %c0_i32_0 = arith.constant 0 : i32
    %c0_i32_1 = arith.constant 0 : i32
    return %c0_i32, %c0_i32_0 : i32, i32
  }
  func.func @transform_3(%arg0: i32) -> (i32, i32) {
    %c0_i32 = arith.constant 0 : i32
    %c0_i32_0 = arith.constant 0 : i32
    %c0_i32_1 = arith.constant 0 : i32
    return %c0_i32, %c0_i32_0 : i32, i32
  }
}

</mosaic_0001>

<bundles_post_ra>
// kernel: tpu_custom_call.1
= control target key start
LH: loop header
LB: loop body
LE: loop exit
PB: predicated region body
PF: predicated region fallthrough
CT: control target
= control target key end

     0   :  { %8 = vsyncpa [#allocation3], 0  ;;  %s595_s0 = inlined_call_operand.hbm [shape: bf16[16,128], index: 0, kind: input, shape index: {}]   ;;  %s596_s1 = inlined_call_operand.hbm [shape: f32[16,128], index: 1, kind: input, shape index: {}]   ;;  %s597_s2 = inlined_call_operand.hbm [shape: f32[128,128], index: 2, kind: input, shape index: {}]   ;;  %s598_s3 = inlined_call_operand.hbm [shape: f32[128,128], index: 3, kind: output, shape index: {}]  }
   0x1   :  { %9 = vsyncpa [#allocation6], 0 }
   0x2   :  { %10 = vsyncpa [#allocation4], 0  ;;  %s502_s12 = smov [#allocation5]   ;;  %s408_s16 = scalar_lea.hbm %s596_s1, 256 }
   0x3   :  { %s28_s13 = sshll.u32 %s502_s12, 4  ;;  %p409_p0 = scmp.ne.s32.totalorder %s596_s1, %s408_s16  ;;  %s29_s13 = int_to_ptr.vmem [resolvable:$true] %s28_s13 }
   0x4   :  { %p412_p1 = scmp.lt.u32.totalorder %s408_s16, %s596_s1 }
   0x6   :  { %p414_p2 = pnand %p412_p1, %p409_p0 }
   0x8   :  { %417 = shalt.err (!%p414_p2)
}
   0x9   :  { %s418_s21 = scalar_lea.vmem %s29_s13, 256  ;;  %p423_p4 = scmp.lt.s32.totalorder %s29_s13, %s29_s13 }
   0xa   :  { %p419_p3 = scmp.ne.s32.totalorder %s29_s13, %s418_s21  ;;  %p424_p5 = scmp.lt.s32.totalorder %s418_s21, %s418_s21 }
   0xc   :  { %p425_p6 = por %p424_p5, %p423_p4 }
   0xe   :  { %p426_p7 = pnand %p425_p6, %p419_p3 }
  0x10   :  { %429 = shalt.err (!%p426_p7)
}
  0x11   :  { %s503_s22 = smov 128   ;;  %s504_s23 = smov 8  }
  0x12   :  { %34 = dma.hbm_to_vmem [thread:$0]  %s596_s1, 256, %s29_s13, [#allocation6], %s503_s22, %s503_s22, %s504_s23  }
  0x13   :  { %s505_s26 = smov [#allocation2]   ;;  %s430_s30 = scalar_lea.hbm %s595_s0, 128 }
  0x14   :  { %s16_s27 = sshll.u32 %s505_s26, 4  ;;  %p431_p8 = scmp.ne.s32.totalorder %s595_s0, %s430_s30  ;;  %s17_s27 = int_to_ptr.vmem [resolvable:$true] %s16_s27 }
  0x15   :  { %p434_p9 = scmp.lt.u32.totalorder %s430_s30, %s595_s0 }
  0x17   :  { %p436_p10 = pnand %p434_p9, %p431_p8 }
  0x19   :  { %439 = shalt.err (!%p436_p10)
}
  0x1a   :  { %s440_s8 = scalar_lea.vmem %s17_s27, 128  ;;  %p445_p12 = scmp.lt.s32.totalorder %s17_s27, %s17_s27 }
  0x1b   :  { %p441_p11 = scmp.ne.s32.totalorder %s17_s27, %s440_s8  ;;  %p446_p13 = scmp.lt.s32.totalorder %s440_s8, %s440_s8 }
  0x1d   :  { %p447_p0 = por %p446_p13, %p445_p12 }
  0x1f   :  { %p448_p1 = pnand %p447_p0, %p441_p11 }
  0x21   :  { %451 = shalt.err (!%p448_p1)
}
  0x22   :  { %s506_s1 = smov 64   ;;  %s507_s9 = smov 4  }
  0x23   :  { %22 = dma.hbm_to_vmem [thread:$0]  %s595_s0, 128, %s17_s27, [#allocation3], %s506_s1, %s506_s1, %s507_s9  }
  0x24   :  { %s508_s12 = smov [#allocation7]   ;;  %s452_s16 = scalar_lea.hbm %s597_s2, 2048 }
  0x25   :  { %s40_s13 = sshll.u32 %s508_s12, 4  ;;  %p453_p2 = scmp.ne.s32.totalorder %s597_s2, %s452_s16  ;;  %s41_s13 = int_to_ptr.vmem [resolvable:$true] %s40_s13 }
  0x26   :  { %p456_p3 = scmp.lt.u32.totalorder %s452_s16, %s597_s2 }
  0x28   :  { %p458_p4 = pnand %p456_p3, %p453_p2 }
  0x2a   :  { %461 = shalt.err (!%p458_p4)
}
  0x2b   :  { %s462_s21 = scalar_lea.vmem %s41_s13, 2048  ;;  %p467_p6 = scmp.lt.s32.totalorder %s41_s13, %s41_s13 }
  0x2c   :  { %p463_p5 = scmp.ne.s32.totalorder %s41_s13, %s462_s21  ;;  %p468_p7 = scmp.lt.s32.totalorder %s462_s21, %s462_s21 }
  0x2e   :  { %p469_p8 = por %p468_p7, %p467_p6 }
  0x30   :  { %p470_p9 = pnand %p469_p8, %p463_p5 }
  0x32   :  { %473 = shalt.err (!%p470_p9)
}
  0x33   :  { %46 = dma.hbm_to_vmem [thread:$0]  %s597_s2, 2048, %s41_s13, [#allocation6], %s503_s22, %s503_s22, %s504_s23  }
  0x34   :  { %496 = dma.done.wait [#allocation3], 128  }
  0x35   :  { %497 = vsyncadd [#allocation3], 4294967168 }
  0x36   :  { %498 = dma.done.wait [#allocation6], 2304  }
  0x37   :  { %499 = vsyncadd [#allocation6], 4294964992  ;;  %v407_v0 = vld [vmem:[#allocation2] sm:$0xff]   ;;  %v95_v1 = vld [vmem:[#allocation5] sm:$0xff]  ;;  %vm120_vm0 = vcmask 130048   ;;  %s509_s2 = smov [#allocation8]  }
  0x38   :  { %v96_v2 = vld [vmem:[#allocation5 + $0x8] sm:$0xff]  ;;  %104 = vxpose.xlu0.c.b16.start.end [1/1] (short) %v407_v0, 128  ;;  %v295_v13 = vld [vmem:[#allocation7 + $0x10] sm:$0xff]  ;;  %v293_v15 = vld [vmem:[#allocation7] sm:$0xff]  ;;  %s346_s25 = sshll.u32 %s509_s2, 4  ;;  %s347_s25 = int_to_ptr.vmem [resolvable:$true] %s346_s25 }
  0x39   :  { %v97_v3 = vpack.c.bf16 %v96_v2, %v95_v1  ;;  %v296_v17 = vld [vmem:[#allocation7 + $0x18] sm:$0xff]  ;;  %v294_v20 = vld [vmem:[#allocation7 + $0x8] sm:$0xff]  ;;  %v299_v25 = vld [vmem:[#allocation7 + $0x30] sm:$0xff]  ;;  %s474_s26 = scalar_lea.vmem %s347_s25, 2048  ;;  %p479_p11 = scmp.lt.s32.totalorder %s347_s25, %s347_s25 }
  0x3a   :  { %v297_v27 = vld [vmem:[#allocation7 + $0x20] sm:$0xff]  ;;  %v300_v29 = vld [vmem:[#allocation7 + $0x38] sm:$0xff]  ;;  %v298_v32 = vld [vmem:[#allocation7 + $0x28] sm:$0xff]  ;;  %p475_p10 = scmp.ne.s32.totalorder %s347_s25, %s474_s26  ;;  %p480_p12 = scmp.lt.s32.totalorder %s474_s26, %s474_s26 }
  0x3b   :  { %377 = vmatprep.subr.bf16.mxu0 %v97_v3  ;;  %395 = vmatprep.subr.bf16.mxu1 %v97_v3  ;;  %v303_v37 = vld [vmem:[#allocation7 + $0x50] sm:$0xff]  ;;  %v301_v39 = vld [vmem:[#allocation7 + $0x40] sm:$0xff]  ;;  %v304_v41 = vld [vmem:[#allocation7 + $0x58] sm:$0xff] }
  0x3c   :  { %378 = vmatpush3.bf16.msra.mxu0 %v97_v3  ;;  %396 = vmatpush3.bf16.msra.mxu1 %v97_v3  ;;  %v302_v44 = vld [vmem:[#allocation7 + $0x48] sm:$0xff]  ;;  %v307_v49 = vld [vmem:[#allocation7 + $0x70] sm:$0xff]  ;;  %v305_v51 = vld [vmem:[#allocation7 + $0x60] sm:$0xff]  ;;  %p481_p13 = por %p480_p12, %p479_p11 }
  0x3d   :  { %v308_v53 = vld [vmem:[#allocation7 + $0x78] sm:$0xff]  ;;  %v306_v56 = vld [vmem:[#allocation7 + $0x68] sm:$0xff] }
  0x3e   :  { %p482_p0 = pnand %p481_p13, %p475_p10 }
  0x9e   :  { %v112_v4 = vpop.trf.xlu0 }
  0x9f   :  { %379 = vmatprep.mubr.msk.bf16.mxu0 %vm120_vm0, %v112_v4 }
  0xa2   :  { %v113_v5 = vpop.trf.xlu0 }
  0xa3   :  { %380 = vmatmul.mubr.msk.bf16.vlgmr.msra.gmra.mrb[0].mxu0 %vm120_vm0, %v113_v5 }
  0xa6   :  { %v114_v6 = vpop.trf.xlu0 }
  0xa7   :  { %383 = vmatprep.mubr.msk.bf16.mxu0 %vm120_vm0, %v114_v6 }
  0xaa   :  { %v115_v7 = vpop.trf.xlu0 }
  0xab   :  { %384 = vmatmul.mubr.msk.bf16.gmra.mrb[4].mxu0 %vm120_vm0, %v115_v7 }
  0xae   :  { %v116_v8 = vpop.trf.xlu0 }
  0xaf   :  { %387 = vmatprep.mubr.msk.bf16.mxu1 %vm120_vm0, %v116_v8 }
  0xb2   :  { %v117_v9 = vpop.trf.xlu0 }
  0xb3   :  { %388 = vmatmul.mubr.msk.bf16.vlgmr.msra.gmra.mrb[0].mxu1 %vm120_vm0, %v117_v9 }
  0xb6   :  { %v118_v10 = vpop.trf.xlu0 }
  0xb7   :  { %391 = vmatprep.mubr.msk.bf16.mxu1 %vm120_vm0, %v118_v10 }
  0xba   :  { %v119_v11 = vpop.trf.xlu0 }
  0xbb   :  { %392 = vmatmul.mubr.msk.bf16.gmra.mrb[4].mxu1 %vm120_vm0, %v119_v11 }
 0x176   :  { %v381_v12 = vpop.f32.mrb[0].mxu0 }
 0x177   :  { %v179_v14 = vpop.f32.mrb[1].mxu0  ;;  %v311_v18 = vmul.f32 %v381_v12, %v295_v13 }
 0x178   :  { %v382_v16 = vpop.f32.mrb[2].mxu0  ;;  %v309_v21 = vmul.f32 %v293_v15, %v179_v14 }
 0x179   :  { %v182_v19 = vpop.f32.mrb[3].mxu0  ;;  %327 = vst [vmem:[#allocation8 + $0x10] sm:$0xff] %v311_v18  ;;  %v312_v22 = vmul.f32 %v382_v16, %v296_v17 }
 0x17a   :  { %325 = vst [vmem:[#allocation8] sm:$0xff] %v309_v21  ;;  %v310_v23 = vmul.f32 %v294_v20, %v182_v19 }
 0x17b   :  { %328 = vst [vmem:[#allocation8 + $0x18] sm:$0xff] %v312_v22 }
 0x17c   :  { %326 = vst [vmem:[#allocation8 + $0x8] sm:$0xff] %v310_v23 }
 0x17e   :  { %v385_v24 = vpop.f32.mrb[4].mxu0 }
 0x17f   :  { %v195_v26 = vpop.f32.mrb[5].mxu0  ;;  %v315_v30 = vmul.f32 %v385_v24, %v299_v25 }
 0x180   :  { %v386_v28 = vpop.f32.mrb[6].mxu0  ;;  %v313_v33 = vmul.f32 %v297_v27, %v195_v26 }
 0x181   :  { %v198_v31 = vpop.f32.mrb[7].mxu0  ;;  %331 = vst [vmem:[#allocation8 + $0x30] sm:$0xff] %v315_v30  ;;  %v316_v34 = vmul.f32 %v386_v28, %v300_v29 }
 0x182   :  { %329 = vst [vmem:[#allocation8 + $0x20] sm:$0xff] %v313_v33  ;;  %v314_v35 = vmul.f32 %v298_v32, %v198_v31 }
 0x183   :  { %332 = vst [vmem:[#allocation8 + $0x38] sm:$0xff] %v316_v34 }
 0x184   :  { %330 = vst [vmem:[#allocation8 + $0x28] sm:$0xff] %v314_v35 }
 0x186   :  { %v389_v36 = vpop.f32.mrb[0].mxu1 }
 0x187   :  { %v211_v38 = vpop.f32.mrb[1].mxu1  ;;  %v319_v42 = vmul.f32 %v389_v36, %v303_v37 }
 0x188   :  { %v390_v40 = vpop.f32.mrb[2].mxu1  ;;  %v317_v45 = vmul.f32 %v301_v39, %v211_v38 }
 0x189   :  { %v214_v43 = vpop.f32.mrb[3].mxu1  ;;  %335 = vst [vmem:[#allocation8 + $0x50] sm:$0xff] %v319_v42  ;;  %v320_v46 = vmul.f32 %v390_v40, %v304_v41 }
 0x18a   :  { %333 = vst [vmem:[#allocation8 + $0x40] sm:$0xff] %v317_v45  ;;  %v318_v47 = vmul.f32 %v302_v44, %v214_v43 }
 0x18b   :  { %336 = vst [vmem:[#allocation8 + $0x58] sm:$0xff] %v320_v46 }
 0x18c   :  { %334 = vst [vmem:[#allocation8 + $0x48] sm:$0xff] %v318_v47 }
 0x18e   :  { %v393_v48 = vpop.f32.mrb[4].mxu1 }
 0x18f   :  { %v227_v50 = vpop.f32.mrb[5].mxu1  ;;  %v323_v54 = vmul.f32 %v393_v48, %v307_v49 }
 0x190   :  { %v394_v52 = vpop.f32.mrb[6].mxu1  ;;  %v321_v57 = vmul.f32 %v305_v51, %v227_v50 }
 0x191   :  { %v230_v55 = vpop.f32.mrb[7].mxu1  ;;  %339 = vst [vmem:[#allocation8 + $0x70] sm:$0xff] %v323_v54  ;;  %v324_v58 = vmul.f32 %v394_v52, %v308_v53 }
 0x192   :  { %337 = vst [vmem:[#allocation8 + $0x60] sm:$0xff] %v321_v57  ;;  %v322_v59 = vmul.f32 %v306_v56, %v230_v55 }
 0x193   :  { %340 = vst [vmem:[#allocation8 + $0x78] sm:$0xff] %v324_v58 }
 0x194   :  { %338 = vst [vmem:[#allocation8 + $0x68] sm:$0xff] %v322_v59 }
 0x195   :  { %485 = shalt.err (!%p482_p0)
}
 0x196   :  { %s486_s29 = scalar_lea.hbm %s598_s3, 2048 }
 0x197   :  { %p487_p1 = scmp.ne.s32.totalorder %s598_s3, %s486_s29  ;;  %p490_p2 = scmp.lt.u32.totalorder %s486_s29, %s598_s3 }
 0x199   :  { %p492_p3 = pnand %p490_p2, %p487_p1 }
 0x19b   :  { %495 = shalt.err (!%p492_p3)
}
 0x19c   :  { %352 = dma.vmem_to_hbm [thread:$0]  %s347_s25, 2048, %s598_s3, [#allocation4], %s503_s22, %s503_s22, %s504_s23  }
 0x19d   :  { %500 = dma.done.wait [#allocation4], 2048  }
 0x19e   :  { %501 = vsyncadd [#allocation4], 4294965248 }
 0x19f   :  { %356 = vsyncpa [#allocation3], 1 }
 0x1a0   :  { %357 = vsyncpa [#allocation6], 1 }
 0x1a1   :  { %358 = vsyncpa [#allocation4], 1 }

</bundles_post_ra>
